<compile_context>
chip_gen: v6e
topology: v6e:2x2x1
jax: 0.10.0
libtpu: 0.0.40
codegen_flags: <defaults>
</compile_context>

<pallas_src>
import jax
import jax.numpy as jnp
from jax.experimental import pallas as pl
from jax.experimental.pallas import tpu as pltpu


def _rmsnorm_kernel(eps, true_dim):
    inv_dim = 1.0 / float(true_dim)

    def kernel(x_ref, w_ref, o_ref):
        # Promote to f32 (matches x.float(); also required on v5e — no bf16 VPU/EUP).
        x = x_ref[...].astype(jnp.float32)
        # sum / true_dim instead of jnp.mean so zero-padded lanes (dim padded to
        # a multiple of 128) do not perturb the mean.
        ms = jnp.sum(x * x, axis=-1, keepdims=True) * inv_dim   # XLU reduce
        inv = jax.lax.rsqrt(ms + eps)                           # EUP transcendental
        # .type_as(x) BEFORE the weight multiply, exactly as in PyTorch.
        normed = (x * inv).astype(x_ref.dtype)
        o_ref[...] = (normed * w_ref[...]).astype(o_ref.dtype)

    return kernel


# Per-grid-step VMEM budget: 2 input bufs + 2 output bufs (double buffering)
# + ~2 f32 compute intermediates.  Kept well under the 32 MiB scoped limit
# that is the default on v7x (64 MiB physical per TC).
_VMEM_TILE_BUDGET = 20 * 1024 * 1024
# Per-step input-slab target: a few MiB amortizes the ~0.35 us/step overhead.
_TARGET_TILE_BYTES = 8 * 1024 * 1024
_VMEM_LIMIT_FLOOR = 32 * 1024 * 1024


def _pick_block_rows(rows, dim, in_itemsize, out_itemsize):
    """Row tile sized by bytes: fits VMEM (incl. f32 scratch), amortizes step cost."""
    # Bytes of VMEM needed per tile row in one grid step.
    per_row = dim * (2 * in_itemsize + 2 * out_itemsize + 2 * 4)
    vmem_rows = max(_VMEM_TILE_BUDGET // per_row, 8)

    target_rows = max(_TARGET_TILE_BYTES // (dim * in_itemsize), 8)

    br = min(vmem_rows, target_rows)

    # v7x has 2 TensorCores; keep >= 2 grid steps whenever rows allow so the
    # "parallel" axis shards across both.
    if rows >= 64:
        br = min(br, pl.cdiv(rows, 2))

    if br >= rows:
        return rows                       # single full-extent block (always valid)

    # Sublane packing: 8 for f32, 16 for bf16, 32 for int8.
    mult = max(8, 32 // in_itemsize)
    br = max((br // mult) * mult, mult)
    # TODO(synk): for extremely large dim (f32 dim >~ 500K) even `mult` rows can
    # exceed the VMEM limit — would need to block the dim axis as well.
    return min(br, rows)


def rmsnorm(x, weight, eps=1e-6, block_rows=None):
    """RMSNorm over the last axis of x. weight has shape (dim,)."""
    orig_shape = x.shape
    dim = orig_shape[-1]
    x2d = x.reshape(-1, dim)
    rows = x2d.shape[0]

    # Output dtype follows PyTorch's promotion of (x.dtype, weight.dtype);
    # weight stays in its own dtype (no f32 promotion).
    out_dtype = jnp.promote_types(x.dtype, weight.dtype)

    # Lane-dense stores: pad dim up to a multiple of 128.  Weight padding is
    # zero, so padded output columns are zero and get sliced off; the mean uses
    # the true dim inside the kernel.  No-op for the usual dim % 128 == 0 case.
    dim_p = pl.cdiv(dim, 128) * 128
    w2d = weight.reshape(1, dim)
    if dim_p != dim:
        x2d = jnp.pad(x2d, ((0, 0), (0, dim_p - dim)))
        w2d = jnp.pad(w2d, ((0, 0), (0, dim_p - dim)))

    in_itemsize = x2d.dtype.itemsize
    out_itemsize = jnp.dtype(out_dtype).itemsize

    if block_rows is None:
        block_rows = _pick_block_rows(rows, dim_p, in_itemsize, out_itemsize)
    block_rows = max(1, min(block_rows, rows))

    # Partial trailing block is handled by Pallas (masked edge stores); no row
    # padding or output slicing — rows are fully independent.
    grid = pl.cdiv(rows, block_rows)

    per_step_bytes = block_rows * dim_p * (2 * in_itemsize + 2 * out_itemsize + 2 * 4)
    vmem_limit = int(max(_VMEM_LIMIT_FLOOR, min(per_step_bytes + (4 << 20), 64 << 20)))

    cost = pl.CostEstimate(
        flops=4 * rows * dim,
        transcendentals=rows,
        bytes_accessed=rows * dim * (in_itemsize + out_itemsize)
        + dim * weight.dtype.itemsize,
    )

    out = pl.pallas_call(
        _rmsnorm_kernel(eps, dim),
        out_shape=jax.ShapeDtypeStruct((rows, dim_p), out_dtype),
        grid_spec=pltpu.PrefetchScalarGridSpec(
            num_scalar_prefetch=0,
            grid=(grid,),
            in_specs=[
                pl.BlockSpec((block_rows, dim_p), lambda i: (i, 0)),
                pl.BlockSpec((1, dim_p), lambda i: (0, 0)),
            ],
            out_specs=pl.BlockSpec((block_rows, dim_p), lambda i: (i, 0)),
        ),
        compiler_params=pltpu.CompilerParams(
            dimension_semantics=("parallel",),   # shards grid across v7x's 2 TCs
            vmem_limit_bytes=vmem_limit,
        ),
        cost_estimate=cost,
    )(x2d, w2d)

    if dim_p != dim:
        out = out[:, :dim]
    return out.reshape(orig_shape[:-1] + (dim,))


if __name__ == "__main__":
    key = jax.random.PRNGKey(0)
    k1, k2, k3 = jax.random.split(key, 3)
    eps = 1e-6

    def ref_rmsnorm(x, weight, eps):
        xf = x.astype(jnp.float32)
        n = xf * jax.lax.rsqrt(jnp.mean(xf * xf, axis=-1, keepdims=True) + eps)
        return n.astype(x.dtype) * weight

    # Case 1: small f32 shapes implied by the module (batch=2, seq=8, hidden=128).
    B, S, D = 2, 8, 128
    x = jax.random.normal(k1, (B, S, D), dtype=jnp.float32)
    w = jnp.ones((D,), dtype=jnp.float32)          # nn.Parameter(torch.ones(dim))
    out = jax.block_until_ready(rmsnorm(x, w, eps=eps))
    ref = ref_rmsnorm(x, w, eps)
    assert out.shape == (B, S, D) and out.dtype == ref.dtype
    assert jnp.allclose(out, ref, atol=1e-5, rtol=1e-5), "f32 mismatch vs reference"

    # Case 2: bf16 x + bf16 weight, rows=400 with auto tiling — exercises the
    # multi-step "parallel" grid with a PARTIAL trailing block (no padding path).
    B2, S2, D2 = 2, 200, 256
    xb = jax.random.normal(k2, (B2, S2, D2), dtype=jnp.float32).astype(jnp.bfloat16)
    wb = (1.0 + 0.01 * jnp.arange(D2, dtype=jnp.float32)).astype(jnp.bfloat16)
    outb = jax.block_until_ready(rmsnorm(xb, wb, eps=eps))
    refb = ref_rmsnorm(xb, wb, eps)
    assert outb.shape == (B2, S2, D2) and outb.dtype == jnp.bfloat16
    assert jnp.allclose(
        outb.astype(jnp.float32), refb.astype(jnp.float32), atol=2e-2, rtol=2e-2
    ), "bf16 mismatch vs reference"

    # Case 3: dim not a multiple of 128 — exercises the lane-dense padding path
    # (mean still taken over the true dim).
    B3, S3, D3 = 2, 8, 96
    xc = jax.random.normal(k3, (B3, S3, D3), dtype=jnp.float32)
    wc = 1.0 + 0.02 * jnp.arange(D3, dtype=jnp.float32)
    outc = jax.block_until_ready(rmsnorm(xc, wc, eps=eps))
    refc = ref_rmsnorm(xc, wc, eps)
    assert outc.shape == (B3, S3, D3)
    assert jnp.allclose(outc, refc, atol=1e-5, rtol=1e-5), "non-128 dim mismatch"

    print("KERNEL_OK")
</pallas_src>

<mosaic_0001>
module attributes {stable_mosaic.version = 11 : i64} {
  func.func @kernel(%arg0: i32, %arg1: memref<16x128xf32, #tpu.memory_space<vmem>>, %arg2: memref<1x128xf32, #tpu.memory_space<vmem>>, %arg3: memref<16x128xf32, #tpu.memory_space<vmem>>) attributes {dimension_semantics = [#tpu.dimension_semantics<parallel>], iteration_bounds = array<i64: 1>, scalar_prefetch = 0 : i64, scratch_operands = 0 : i64, tpu.core_type = #tpu.core_type<tc>, window_params = [{transform_indices = @transform_0, window_bounds = array<i64: 16, 128>}, {pipeline_mode = #tpu.pipeline_mode<synchronous>, transform_indices = @transform_1, window_bounds = array<i64: 1, 128>}, {transform_indices = @transform_2, window_bounds = array<i64: 16, 128>}]} {
    %c0 = arith.constant 0 : index
    %c0_0 = arith.constant 0 : index
    %0 = vector.load %arg1[%c0, %c0_0] : memref<16x128xf32, #tpu.memory_space<vmem>>, vector<16x128xf32>
    %1 = arith.mulf %0, %0 : vector<16x128xf32>
    %cst = arith.constant dense<0.000000e+00> : vector<16xf32>
    %2 = vector.multi_reduction <add>, %1, %cst [1] : vector<16x128xf32> to vector<16xf32>
    %3 = vector.shape_cast %2 : vector<16xf32> to vector<16x1xf32>
    %cst_1 = arith.constant 7.812500e-03 : f32
    %4 = vector.broadcast %cst_1 : f32 to vector<16x1xf32>
    %5 = arith.mulf %3, %4 : vector<16x1xf32>
    %cst_2 = arith.constant 9.99999997E-7 : f32
    %6 = vector.broadcast %cst_2 : f32 to vector<16x1xf32>
    %7 = arith.addf %5, %6 : vector<16x1xf32>
    %8 = math.rsqrt %7 : vector<16x1xf32>
    %9 = vector.broadcast %8 : vector<16x1xf32> to vector<16x128xf32>
    %10 = arith.mulf %0, %9 : vector<16x128xf32>
    %c0_3 = arith.constant 0 : index
    %c0_4 = arith.constant 0 : index
    %11 = vector.load %arg2[%c0_3, %c0_4] : memref<1x128xf32, #tpu.memory_space<vmem>>, vector<1x128xf32>
    %12 = vector.broadcast %11 : vector<1x128xf32> to vector<16x128xf32>
    %13 = arith.mulf %10, %12 : vector<16x128xf32>
    %c0_5 = arith.constant 0 : index
    %c0_6 = arith.constant 0 : index
    %14 = vector.load %arg3[%c0_5, %c0_6] : memref<16x128xf32, #tpu.memory_space<vmem>>, vector<16x128xf32>
    tpu.vector_store %arg3[%c0_5, %c0_6], %13 {strides = array<i32>} : memref<16x128xf32, #tpu.memory_space<vmem>>, vector<16x128xf32>,
    return
  }
  func.func @transform_0(%arg0: i32) -> (i32, i32) {
    %c0_i32 = arith.constant 0 : i32
    %c0_i32_0 = arith.constant 0 : i32
    return %arg0, %c0_i32 : i32, i32
  }
  func.func @transform_1(%arg0: i32) -> (i32, i32) {
    %c0_i32 = arith.constant 0 : i32
    %c0_i32_0 = arith.constant 0 : i32
    %c0_i32_1 = arith.constant 0 : i32
    return %c0_i32, %c0_i32_0 : i32, i32
  }
  func.func @transform_2(%arg0: i32) -> (i32, i32) {
    %c0_i32 = arith.constant 0 : i32
    %c0_i32_0 = arith.constant 0 : i32
    return %arg0, %c0_i32 : i32, i32
  }
}

</mosaic_0001>

<bundles_post_ra>
// kernel: tpu_custom_call.1
= control target key start
LH: loop header
LB: loop body
LE: loop exit
PB: predicated region body
PF: predicated region fallthrough
CT: control target
= control target key end

     0   :  { %7 = vsyncpa [#allocation3], 0  ;;  %s157_s0 = inlined_call_operand.hbm [shape: f32[16,128], index: 0, kind: input, shape index: {}]   ;;  %s158_s1 = inlined_call_operand.vmem [shape: f32[1,128], index: 1, kind: input, shape index: {}]   ;;  %s159_s2 = inlined_call_operand.hbm [shape: f32[16,128], index: 2, kind: output, shape index: {}]  }
   0x1   :  { %8 = vsyncpa [#allocation4], 0  ;;  %s123_s9 = smov [#allocation2]  }
   0x2   :  { %s14_s10 = sshll.u32 %s123_s9, 4  ;;  %s15_s10 = int_to_ptr.vmem [resolvable:$true] %s14_s10 }
   0x3   :  { %s87_s11 = scalar_lea.vmem %s15_s10, 256  ;;  %p92_p1 = scmp.lt.s32.totalorder %s15_s10, %s15_s10 }
   0x4   :  { %p88_p0 = scmp.ne.s32.totalorder %s15_s10, %s87_s11  ;;  %p93_p2 = scmp.lt.s32.totalorder %s87_s11, %s87_s11 }
   0x6   :  { %p94_p3 = por %p93_p2, %p92_p1 }
   0x8   :  { %p95_p4 = pnand %p94_p3, %p88_p0 }
   0xa   :  { %98 = shalt.err (!%p95_p4)
}
   0xb   :  { %s124_s12 = smov 128   ;;  %s125_s13 = smov 8  }
   0xc   :  { %20 = dma.hbm_to_vmem [thread:$0]  %s157_s0, 256, %s15_s10, [#allocation3], %s124_s12, %s124_s12, %s125_s13  }
   0xd   :  { %119 = dma.done.wait [#allocation3], 256  }
   0xe   :  { %120 = vsyncadd [#allocation3], 4294967040  ;;  %v26_v0 = vld [vmem:[#allocation2] sm:$0xff]  ;;  %v27_v1 = vld [vmem:[#allocation2 + $0x8] sm:$0xff]  ;;  %s126_s0 = smov [#allocation5]  }
   0xf   :  { %v28_v2 = vmul.f32 %v26_v0, %v26_v0  ;;  %v29_v3 = vmul.f32 %v27_v1, %v27_v1  ;;  %v70_v11 = vld [vmem:[%s158_s1] ss:$0 sm:$0xff]  ;;  %s58_s18 = sshll.u32 %s126_s0, 4  ;;  %s59_s18 = int_to_ptr.vmem [resolvable:$true] %s58_s18 }
  0x10   :  { %s99_s19 = scalar_lea.vmem %s59_s18, 256  ;;  %p104_p6 = scmp.lt.s32.totalorder %s59_s18, %s59_s18 }
  0x11   :  { %30 = vadd.xlane.f32.xlu0 %v28_v2  ;;  %p100_p5 = scmp.ne.s32.totalorder %s59_s18, %s99_s19  ;;  %p105_p7 = scmp.lt.s32.totalorder %s99_s19, %s99_s19 }
  0x13   :  { %p106_p8 = por %p105_p7, %p104_p6 }
  0x15   :  { %32 = vadd.xlane.f32.xlu0 %v29_v3  ;;  %p107_p9 = pnand %p106_p8, %p100_p5 }
  0x9a   :  { %v31_v4 = vpop.xlane.xlu0 %30 }
  0x9b   :  { %v34_v5 = vmul.f32 0.0078125, %v31_v4 }
  0x9d   :  { %v36_v6 = vadd.f32 1e-06, %v34_v5 }
  0x9e   :  { %v33_v7 = vpop.xlane.xlu0 %32 }
  0x9f   :  { %75 = vrsqrt.f32 %v36_v6  ;;  %v35_v8 = vmul.f32 0.0078125, %v33_v7 }
  0xa1   :  { %v37_v9 = vadd.f32 1e-06, %v35_v8 }
  0xa3   :  { %77 = vrsqrt.f32 %v37_v9 }
  0xac   :  { %v76_v10 = vpop.eup %75 }
  0xad   :  { %v40_v12 = vmul.f32 %v76_v10, %v26_v0 }
  0xaf   :  { %v49_v13 = vmul.f32 %v70_v11, %v40_v12 }
  0xb0   :  { %v78_v14 = vpop.eup %77 }
  0xb1   :  { %v41_v15 = vmul.f32 %v78_v14, %v27_v1  ;;  %51 = vst [vmem:[#allocation5] sm:$0xff] %v49_v13 }
  0xb3   :  { %v50_v16 = vmul.f32 %v70_v11, %v41_v15 }
  0xb5   :  { %52 = vst [vmem:[#allocation5 + $0x8] sm:$0xff] %v50_v16 }
  0xb6   :  { %110 = shalt.err (!%p107_p9)
}
  0xb7   :  { %64 = dma.vmem_to_hbm [thread:$0]  %s59_s18, 256, %s159_s2, [#allocation4], %s124_s12, %s124_s12, %s125_s13  }
  0xb8   :  { %121 = dma.done.wait [#allocation4], 256  }
  0xb9   :  { %122 = vsyncadd [#allocation4], 4294967040 }
  0xba   :  { %68 = vsyncpa [#allocation3], 1 }
  0xbb   :  { %69 = vsyncpa [#allocation4], 1 }

</bundles_post_ra>
